<compile_context>
chip_gen: v6e
topology: v6e:2x2x1
jax: 0.10.0
libtpu: 0.0.40
codegen_flags: <defaults>
</compile_context>

<pallas_src>
import numpy as np
import jax
import jax.numpy as jnp
from jax.experimental import pallas as pl
from jax.experimental.pallas import tpu as pltpu


def _round_up(x: int, m: int) -> int:
    return -(-x // m) * m


# ---------------------------------------------------------------------------
# Pallas kernel: two MXU matmuls into one f32 accumulator + f32 bias epilogue.
#   px_ref  : (TL, Fp)    bf16   pixel patches      (row tile)
#   m_ref   : (TL, NPp)   bf16   resize operator    (row tile)
#   wt_ref  : (Fp, Dp)    bf16   W^T                (resident)
#   pos_ref : (NPp, Dp)   bf16   position table     (resident)
#   b_ref   : (1, Dp)     f32    linear bias        (resident)
#   o_ref   : (TL, Dp)    out_dtype
# ---------------------------------------------------------------------------
def _embeddings_kernel(px_ref, m_ref, wt_ref, pos_ref, b_ref, o_ref):
    acc = jnp.dot(px_ref[...], wt_ref[...], preferred_element_type=jnp.float32)
    acc = acc + jnp.dot(m_ref[...], pos_ref[...],
                        preferred_element_type=jnp.float32)
    o_ref[...] = (acc + b_ref[...]).astype(o_ref.dtype)


# ---------------------------------------------------------------------------
# One-time parameter packing (hoisted out of the per-call forward path).
# ---------------------------------------------------------------------------
def pack_siglip2_params(lin_w, lin_b, pos_emb, *, compute_dtype=jnp.bfloat16):
    """lin_w: (D, F)   lin_b: (D,)   pos_emb: (NP, D)."""
    D, F = lin_w.shape
    NP = pos_emb.shape[0]
    F_pad = _round_up(F, 128)
    NP_pad = _round_up(NP, 128)
    D_pad = _round_up(D, 128)
    wt = jnp.pad(jnp.transpose(lin_w).astype(compute_dtype),
                 ((0, F_pad - F), (0, D_pad - D)))
    pos = jnp.pad(pos_emb.astype(compute_dtype),
                  ((0, NP_pad - NP), (0, D_pad - D)))
    bias = jnp.pad(lin_b.astype(jnp.float32).reshape(1, D),
                   ((0, 0), (0, D_pad - D)))
    return dict(wt=wt, pos=pos, bias=bias, F=F, NP=NP, D=D,
                F_pad=F_pad, NP_pad=NP_pad, D_pad=D_pad,
                compute_dtype=compute_dtype)


def _vmem_cap_bytes() -> int:
    """Generation-aware VMEM cap (128 MiB on v5e/v6e, 64 MiB per-TC on v7x)."""
    try:
        cap = int(pltpu.get_tpu_info().vmem_capacity_bytes)
    except Exception:
        cap = 64 << 20          # unknown generation -> assume the smallest
    return max(cap - (16 << 20), 32 << 20)   # leave compiler headroom


# ---------------------------------------------------------------------------
# Forward wrapper.
# ---------------------------------------------------------------------------
def siglip2_vision_embeddings(pixel_values, resize_mat, params, *,
                              tl=1024, out_dtype=jnp.bfloat16):
    """pixel_values: (B, L, F)   resize_mat: (B, L, NP)
    params: output of pack_siglip2_params()   ->   (B, L, D)."""
    B, L, F = pixel_values.shape
    NP = resize_mat.shape[-1]
    assert F == params["F"] and NP == params["NP"]
    D = params["D"]
    F_pad, NP_pad, D_pad = params["F_pad"], params["NP_pad"], params["D_pad"]
    compute_dtype = params["compute_dtype"]

    # --- row tiling: flatten (B, L) into one "parallel" row axis ------------
    rows = B * L
    tl = min(int(tl), _round_up(rows, 16))
    tl = _round_up(tl, 256) if tl >= 256 else max(16, _round_up(tl, 16))
    rows_pad = _round_up(rows, tl)

    # --- activations: cast to weight dtype (module semantics), pad if needed.
    # At production naflex shapes (F=768, NP=256, L=256/1024) pads are no-ops.
    x2d = pixel_values.reshape(rows, F).astype(compute_dtype)
    m2d = resize_mat.reshape(rows, NP).astype(compute_dtype)
    if rows_pad != rows or F_pad != F:
        x2d = jnp.pad(x2d, ((0, rows_pad - rows), (0, F_pad - F)))
    if rows_pad != rows or NP_pad != NP:
        m2d = jnp.pad(m2d, ((0, rows_pad - rows), (0, NP_pad - NP)))

    # --- VMEM budget: resident params (+fallback 2x) + double-buffered tiles.
    c_sz = jnp.dtype(compute_dtype).itemsize
    o_sz = jnp.dtype(out_dtype).itemsize
    param_bytes = (F_pad + NP_pad) * D_pad * c_sz + D_pad * 4
    tile_bytes = 2 * tl * (F_pad + NP_pad) * c_sz + 2 * tl * D_pad * o_sz
    bytes_needed = 2 * param_bytes + tile_bytes + (2 << 20)
    vmem_limit = int(min(max(bytes_needed, 32 << 20), _vmem_cap_bytes()))

    cost = pl.CostEstimate(
        flops=2 * rows_pad * (F_pad + NP_pad) * D_pad,
        transcendentals=0,
        bytes_accessed=(rows_pad * (F_pad + NP_pad) * c_sz
                        + rows_pad * D_pad * o_sz
                        + (F_pad + NP_pad) * D_pad * c_sz + D_pad * 4),
    )

    def call(single_buffer_params):
        pm = {"pipeline_mode": pl.Buffered(1)} if single_buffer_params else {}
        in_specs = [
            pl.BlockSpec((tl, F_pad), lambda r: (r, 0)),        # pixel tile
            pl.BlockSpec((tl, NP_pad), lambda r: (r, 0)),       # resize tile
            pl.BlockSpec((F_pad, D_pad), lambda r: (0, 0), **pm),   # W^T
            pl.BlockSpec((NP_pad, D_pad), lambda r: (0, 0), **pm),  # pos table
            pl.BlockSpec((1, D_pad), lambda r: (0, 0), **pm),       # bias f32
        ]
        return pl.pallas_call(
            _embeddings_kernel,
            out_shape=jax.ShapeDtypeStruct((rows_pad, D_pad), out_dtype),
            grid_spec=pltpu.PrefetchScalarGridSpec(
                num_scalar_prefetch=0,
                grid=(rows_pad // tl,),
                in_specs=in_specs,
                out_specs=pl.BlockSpec((tl, D_pad), lambda r: (r, 0)),
            ),
            compiler_params=pltpu.CompilerParams(
                dimension_semantics=("parallel",),
                vmem_limit_bytes=vmem_limit),
            cost_estimate=cost,
        )(x2d, m2d, params["wt"], params["pos"], params["bias"])

    try:
        out2d = call(True)      # single-buffer the resident parameters
    except Exception:
        out2d = call(False)     # fallback if pipeline_mode is unsupported

    # --- epilogue strip (no-op at production shapes) -------------------------
    if rows_pad != rows:
        out2d = out2d[:rows]
    out = out2d.reshape(B, L, D_pad)
    if D_pad != D:
        out = out[:, :, :D]
    return out


# ---------------------------------------------------------------------------
# Host-side glue: PIL-style antialiased bilinear interpolation weights,
# matching F.interpolate(mode="bilinear", align_corners=False, antialias=True).
# ---------------------------------------------------------------------------
def _interp_weight_matrix(in_size: int, out_size: int) -> np.ndarray:
    scale = in_size / out_size
    filterscale = max(scale, 1.0)        # antialias widens the triangle filter
    support = 1.0 * filterscale          # bilinear filter support = 1.0
    W = np.zeros((out_size, in_size), dtype=np.float64)
    for i in range(out_size):
        center = (i + 0.5) * scale
        xmin = max(int(center - support + 0.5), 0)
        xmax = min(int(center + support + 0.5), in_size)
        ws = []
        for x in range(xmin, xmax):
            w = 1.0 - abs((x - center + 0.5) / filterscale)
            ws.append(max(w, 0.0))
        total = sum(ws)
        for x, w in zip(range(xmin, xmax), ws):
            W[i, x] = w / total
    return W.astype(np.float32)


def build_resize_matrices(spatial_shapes: np.ndarray, side: int,
                          max_length: int) -> np.ndarray:
    """Per-example operator M[b] s.t. resized_pos[b] = M[b] @ pos_flat,
    including the "pad remaining rows with resized[0]" behaviour of the
    PyTorch module (spatial_shapes are concrete host ints, same as the
    per-example Python loop in resize_positional_embeddings)."""
    B = spatial_shapes.shape[0]
    NP = side * side
    M = np.zeros((B, max_length, NP), dtype=np.float32)
    for i in range(B):
        h, w = int(spatial_shapes[i, 0]), int(spatial_shapes[i, 1])
        Wh = _interp_weight_matrix(side, h)      # (h, side)
        Ww = _interp_weight_matrix(side, w)      # (w, side)
        comb = np.einsum("hr,wc->hwrc", Wh, Ww).reshape(h * w, NP)
        M[i, : h * w] = comb
        M[i, h * w:] = comb[0]                   # pad rows = first resized row
    return M


# ---------------------------------------------------------------------------
if __name__ == "__main__":
    # Small config: hidden_size=32, patch_size=2, num_channels=3, num_patches=16
    B, C, P, D = 2, 3, 2, 32
    num_patches = 16                      # position grid is 4x4
    side = int(num_patches ** 0.5)
    L = 16                                # max_num_patches (padded seq length)
    F = C * P * P                         # 12

    key = jax.random.PRNGKey(0)
    k1, k2, k3, k4 = jax.random.split(key, 4)

    pixel_values = jax.random.normal(k1, (B, L, F), dtype=jnp.float32)
    spatial_shapes = np.array([[4, 4], [2, 3]], dtype=np.int64)  # (B, 2)

    # Deterministic "parameters" (same shapes as nn.Linear / nn.Embedding).
    lin_w = jax.random.normal(k2, (D, F), dtype=jnp.float32) * 0.02   # (out, in)
    lin_b = jax.random.normal(k3, (D,), dtype=jnp.float32) * 0.02
    pos_emb = jax.random.normal(k4, (num_patches, D), dtype=jnp.float32) * 0.02

    # Host glue: fold the per-example antialiased-bilinear resize + padding
    # into one (L, num_patches) matrix per example.
    resize_mat = jnp.asarray(build_resize_matrices(spatial_shapes, side, L))

    params = pack_siglip2_params(lin_w, lin_b, pos_emb)   # one-time packing
    out = siglip2_vision_embeddings(pixel_values, resize_mat, params)
    out = jax.block_until_ready(out)

    # Pure-JAX f32 reference (bf16 MXU inputs / bf16 output => loose tol).
    ref = (pixel_values @ lin_w.T + lin_b.reshape(1, D)
           + jnp.einsum("blp,pd->bld", resize_mat, pos_emb))
    assert out.shape == (B, L, D)
    max_err = float(jnp.max(jnp.abs(out.astype(jnp.float32) - ref)))
    assert max_err < 2e-2, f"max abs err {max_err}"

    print("KERNEL_OK")
</pallas_src>

<mosaic_0001>
module attributes {stable_mosaic.version = 11 : i64} {
  func.func @_embeddings_kernel(%arg0: i32, %arg1: memref<32x128xbf16, #tpu.memory_space<vmem>>, %arg2: memref<32x128xbf16, #tpu.memory_space<vmem>>, %arg3: memref<128x128xbf16, #tpu.memory_space<vmem>>, %arg4: memref<128x128xbf16, #tpu.memory_space<vmem>>, %arg5: memref<1x128xf32, #tpu.memory_space<vmem>>, %arg6: memref<32x128xbf16, #tpu.memory_space<vmem>>) attributes {dimension_semantics = [#tpu.dimension_semantics<parallel>], iteration_bounds = array<i64: 1>, scalar_prefetch = 0 : i64, scratch_operands = 0 : i64, tpu.core_type = #tpu.core_type<tc>, window_params = [{transform_indices = @transform_0, window_bounds = array<i64: 32, 128>}, {transform_indices = @transform_1, window_bounds = array<i64: 32, 128>}, {pipeline_mode = #tpu.pipeline_mode<synchronous>, transform_indices = @transform_2, window_bounds = array<i64: 128, 128>}, {pipeline_mode = #tpu.pipeline_mode<synchronous>, transform_indices = @transform_3, window_bounds = array<i64: 128, 128>}, {pipeline_mode = #tpu.pipeline_mode<synchronous>, transform_indices = @transform_4, window_bounds = array<i64: 1, 128>}, {transform_indices = @transform_5, window_bounds = array<i64: 32, 128>}]} {
    %c0 = arith.constant 0 : index
    %c0_0 = arith.constant 0 : index
    %0 = vector.load %arg1[%c0, %c0_0] : memref<32x128xbf16, #tpu.memory_space<vmem>>, vector<32x128xbf16>
    %c0_1 = arith.constant 0 : index
    %c0_2 = arith.constant 0 : index
    %1 = vector.load %arg3[%c0_1, %c0_2] : memref<128x128xbf16, #tpu.memory_space<vmem>>, vector<128x128xbf16>
    %cst = arith.constant dense<0.000000e+00> : vector<32x128xf32>
    %2 = tpu.matmul %0, %1, %cst {dimension_numbers = #tpu.dot_dimension_numbers<[1], [0], [0], [1], [0, 0, 1, 1], [], []>} : vector<32x128xbf16>, vector<128x128xbf16>, vector<32x128xf32> -> vector<32x128xf32>
    %c0_3 = arith.constant 0 : index
    %c0_4 = arith.constant 0 : index
    %3 = vector.load %arg2[%c0_3, %c0_4] : memref<32x128xbf16, #tpu.memory_space<vmem>>, vector<32x128xbf16>
    %c0_5 = arith.constant 0 : index
    %c0_6 = arith.constant 0 : index
    %4 = vector.load %arg4[%c0_5, %c0_6] : memref<128x128xbf16, #tpu.memory_space<vmem>>, vector<128x128xbf16>
    %cst_7 = arith.constant dense<0.000000e+00> : vector<32x128xf32>
    %5 = tpu.matmul %3, %4, %cst_7 {dimension_numbers = #tpu.dot_dimension_numbers<[1], [0], [0], [1], [0, 0, 1, 1], [], []>} : vector<32x128xbf16>, vector<128x128xbf16>, vector<32x128xf32> -> vector<32x128xf32>
    %6 = arith.addf %2, %5 : vector<32x128xf32>
    %c0_8 = arith.constant 0 : index
    %c0_9 = arith.constant 0 : index
    %7 = vector.load %arg5[%c0_8, %c0_9] : memref<1x128xf32, #tpu.memory_space<vmem>>, vector<1x128xf32>
    %8 = vector.broadcast %7 : vector<1x128xf32> to vector<32x128xf32>
    %9 = arith.addf %6, %8 : vector<32x128xf32>
    %10 = arith.truncf %9 : vector<32x128xf32> to vector<32x128xbf16>
    %c0_10 = arith.constant 0 : index
    %c0_11 = arith.constant 0 : index
    %11 = vector.load %arg6[%c0_10, %c0_11] : memref<32x128xbf16, #tpu.memory_space<vmem>>, vector<32x128xbf16>
    tpu.vector_store %arg6[%c0_10, %c0_11], %10 {strides = array<i32>} : memref<32x128xbf16, #tpu.memory_space<vmem>>, vector<32x128xbf16>,
    return
  }
  func.func @transform_0(%arg0: i32) -> (i32, i32) {
    %c0_i32 = arith.constant 0 : i32
    %c0_i32_0 = arith.constant 0 : i32
    return %arg0, %c0_i32 : i32, i32
  }
  func.func @transform_1(%arg0: i32) -> (i32, i32) {
    %c0_i32 = arith.constant 0 : i32
    %c0_i32_0 = arith.constant 0 : i32
    return %arg0, %c0_i32 : i32, i32
  }
  func.func @transform_2(%arg0: i32) -> (i32, i32) {
    %c0_i32 = arith.constant 0 : i32
    %c0_i32_0 = arith.constant 0 : i32
    %c0_i32_1 = arith.constant 0 : i32
    return %c0_i32, %c0_i32_0 : i32, i32
  }
  func.func @transform_3(%arg0: i32) -> (i32, i32) {
    %c0_i32 = arith.constant 0 : i32
    %c0_i32_0 = arith.constant 0 : i32
    %c0_i32_1 = arith.constant 0 : i32
    return %c0_i32, %c0_i32_0 : i32, i32
  }
  func.func @transform_4(%arg0: i32) -> (i32, i32) {
    %c0_i32 = arith.constant 0 : i32
    %c0_i32_0 = arith.constant 0 : i32
    %c0_i32_1 = arith.constant 0 : i32
    return %c0_i32, %c0_i32_0 : i32, i32
  }
  func.func @transform_5(%arg0: i32) -> (i32, i32) {
    %c0_i32 = arith.constant 0 : i32
    %c0_i32_0 = arith.constant 0 : i32
    return %arg0, %c0_i32 : i32, i32
  }
}

module attributes {stable_mosaic.version = 11 : i64} {
  func.func @_embeddings_kernel(%arg0: i32, %arg1: memref<32x128xbf16, #tpu.memory_space<vmem>>, %arg2: memref<32x128xbf16, #tpu.memory_space<vmem>>, %arg3: memref<128x128xbf16, #tpu.memory_space<vmem>>, %arg4: memref<128x128xbf16, #tpu.memory_space<vmem>>, %arg5: memref<1x128xf32, #tpu.memory_space<vmem>>, %arg6: memref<32x128xbf16, #tpu.memory_space<vmem>>) attributes {dimension_semantics = [#tpu.dimension_semantics<parallel>], iteration_bounds = array<i64: 1>, scalar_prefetch = 0 : i64, scratch_operands = 0 : i64, tpu.core_type = #tpu.core_type<tc>, window_params = [{transform_indices = @transform_0, window_bounds = array<i64: 32, 128>}, {transform_indices = @transform_1, window_bounds = array<i64: 32, 128>}, {pipeline_mode = #tpu.pipeline_mode<synchronous>, transform_indices = @transform_2, window_bounds = array<i64: 128, 128>}, {pipeline_mode = #tpu.pipeline_mode<synchronous>, transform_indices = @transform_3, window_bounds = array<i64: 128, 128>}, {pipeline_mode = #tpu.pipeline_mode<synchronous>, transform_indices = @transform_4, window_bounds = array<i64: 1, 128>}, {transform_indices = @transform_5, window_bounds = array<i64: 32, 128>}]} {
    %c0 = arith.constant 0 : index
    %c0_0 = arith.constant 0 : index
    %0 = vector.load %arg1[%c0, %c0_0] : memref<32x128xbf16, #tpu.memory_space<vmem>>, vector<32x128xbf16>
    %c0_1 = arith.constant 0 : index
    %c0_2 = arith.constant 0 : index
    %1 = vector.load %arg3[%c0_1, %c0_2] : memref<128x128xbf16, #tpu.memory_space<vmem>>, vector<128x128xbf16>
    %cst = arith.constant dense<0.000000e+00> : vector<32x128xf32>
    %2 = tpu.matmul %0, %1, %cst {dimension_numbers = #tpu.dot_dimension_numbers<[1], [0], [0], [1], [0, 0, 1, 1], [], []>} : vector<32x128xbf16>, vector<128x128xbf16>, vector<32x128xf32> -> vector<32x128xf32>
    %c0_3 = arith.constant 0 : index
    %c0_4 = arith.constant 0 : index
    %3 = vector.load %arg2[%c0_3, %c0_4] : memref<32x128xbf16, #tpu.memory_space<vmem>>, vector<32x128xbf16>
    %c0_5 = arith.constant 0 : index
    %c0_6 = arith.constant 0 : index
    %4 = vector.load %arg4[%c0_5, %c0_6] : memref<128x128xbf16, #tpu.memory_space<vmem>>, vector<128x128xbf16>
    %cst_7 = arith.constant dense<0.000000e+00> : vector<32x128xf32>
    %5 = tpu.matmul %3, %4, %cst_7 {dimension_numbers = #tpu.dot_dimension_numbers<[1], [0], [0], [1], [0, 0, 1, 1], [], []>} : vector<32x128xbf16>, vector<128x128xbf16>, vector<32x128xf32> -> vector<32x128xf32>
    %6 = arith.addf %2, %5 : vector<32x128xf32>
    %c0_8 = arith.constant 0 : index
    %c0_9 = arith.constant 0 : index
    %7 = vector.load %arg5[%c0_8, %c0_9] : memref<1x128xf32, #tpu.memory_space<vmem>>, vector<1x128xf32>
    %8 = vector.broadcast %7 : vector<1x128xf32> to vector<32x128xf32>
    %9 = arith.addf %6, %8 : vector<32x128xf32>
    %10 = arith.truncf %9 : vector<32x128xf32> to vector<32x128xbf16>
    %c0_10 = arith.constant 0 : index
    %c0_11 = arith.constant 0 : index
    %11 = vector.load %arg6[%c0_10, %c0_11] : memref<32x128xbf16, #tpu.memory_space<vmem>>, vector<32x128xbf16>
    tpu.vector_store %arg6[%c0_10, %c0_11], %10 {strides = array<i32>} : memref<32x128xbf16, #tpu.memory_space<vmem>>, vector<32x128xbf16>,
    return
  }
  func.func @transform_0(%arg0: i32) -> (i32, i32) {
    %c0_i32 = arith.constant 0 : i32
    %c0_i32_0 = arith.constant 0 : i32
    return %arg0, %c0_i32 : i32, i32
  }
  func.func @transform_1(%arg0: i32) -> (i32, i32) {
    %c0_i32 = arith.constant 0 : i32
    %c0_i32_0 = arith.constant 0 : i32
    return %arg0, %c0_i32 : i32, i32
  }
  func.func @transform_2(%arg0: i32) -> (i32, i32) {
    %c0_i32 = arith.constant 0 : i32
    %c0_i32_0 = arith.constant 0 : i32
    %c0_i32_1 = arith.constant 0 : i32
    return %c0_i32, %c0_i32_0 : i32, i32
  }
  func.func @transform_3(%arg0: i32) -> (i32, i32) {
    %c0_i32 = arith.constant 0 : i32
    %c0_i32_0 = arith.constant 0 : i32
    %c0_i32_1 = arith.constant 0 : i32
    return %c0_i32, %c0_i32_0 : i32, i32
  }
  func.func @transform_4(%arg0: i32) -> (i32, i32) {
    %c0_i32 = arith.constant 0 : i32
    %c0_i32_0 = arith.constant 0 : i32
    %c0_i32_1 = arith.constant 0 : i32
    return %c0_i32, %c0_i32_0 : i32, i32
  }
  func.func @transform_5(%arg0: i32) -> (i32, i32) {
    %c0_i32 = arith.constant 0 : i32
    %c0_i32_0 = arith.constant 0 : i32
    return %arg0, %c0_i32 : i32, i32
  }
}

</mosaic_0001>

<bundles_post_ra>
// kernel: tpu_custom_call.1
= control target key start
LH: loop header
LB: loop body
LE: loop exit
PB: predicated region body
PF: predicated region fallthrough
CT: control target
= control target key end

     0   :  { %10 = vsyncpa [#allocation3], 0  ;;  %s690_s0 = inlined_call_operand.hbm [shape: bf16[32,128], index: 0, kind: input, shape index: {}]   ;;  %s691_s1 = inlined_call_operand.hbm [shape: bf16[32,128], index: 1, kind: input, shape index: {}]   ;;  %s692_s2 = inlined_call_operand.hbm [shape: bf16[128,128], index: 2, kind: input, shape index: {}]   ;;  %s693_s3 = inlined_call_operand.hbm [shape: bf16[128,128], index: 3, kind: input, shape index: {}]   ;;  %s694_s4 = inlined_call_operand.vmem [shape: f32[1,128], index: 4, kind: input, shape index: {}]   ;;  %s695_s5 = inlined_call_operand.hbm [shape: bf16[32,128], index: 5, kind: output, shape index: {}]  }
   0x1   :  { %11 = vsyncpa [#allocation6], 0 }
   0x2   :  { %12 = vsyncpa [#allocation9], 0 }
   0x3   :  { %13 = vsyncpa [#allocation4], 0  ;;  %s620_s18 = smov [#allocation5]   ;;  %s621_s20 = smov [#allocation2]  }
   0x4   :  { %s31_s19 = sshll.u32 %s620_s18, 4  ;;  %s19_s21 = sshll.u32 %s621_s20, 4  ;;  %s32_s19 = int_to_ptr.vmem [resolvable:$true] %s31_s19  ;;  %s20_s21 = int_to_ptr.vmem [resolvable:$true] %s19_s21 }
   0x5   :  { %s520_s22 = scalar_lea.vmem %s32_s19, 256  ;;  %p525_p1 = scmp.lt.s32.totalorder %s32_s19, %s32_s19 }
   0x6   :  { %p521_p0 = scmp.ne.s32.totalorder %s32_s19, %s520_s22  ;;  %p526_p2 = scmp.lt.s32.totalorder %s520_s22, %s520_s22 }
   0x8   :  { %p527_p3 = por %p526_p2, %p525_p1 }
   0xa   :  { %p528_p4 = pnand %p527_p3, %p521_p0 }
   0xc   :  { %531 = shalt.err (!%p528_p4)
}
   0xd   :  { %s622_s23 = smov 64   ;;  %s623_s24 = smov 4  }
   0xe   :  { %37 = dma.hbm_to_vmem [thread:$0]  %s691_s1, 256, %s32_s19, [#allocation6], %s622_s23, %s622_s23, %s623_s24  }
   0xf   :  { %s540_s27 = scalar_lea.vmem %s20_s21, 256  ;;  %p545_p6 = scmp.lt.s32.totalorder %s20_s21, %s20_s21 }
  0x10   :  { %p541_p5 = scmp.ne.s32.totalorder %s20_s21, %s540_s27  ;;  %p546_p7 = scmp.lt.s32.totalorder %s540_s27, %s540_s27 }
  0x12   :  { %p547_p8 = por %p546_p7, %p545_p6 }
  0x14   :  { %p548_p9 = pnand %p547_p8, %p541_p5 }
  0x16   :  { %551 = shalt.err (!%p548_p9)
}
  0x17   :  { %25 = dma.hbm_to_vmem [thread:$0]  %s690_s0, 256, %s20_s21, [#allocation3], %s622_s23, %s622_s23, %s623_s24  }
  0x18   :  { %s624_s30 = smov [#allocation7]   ;;  %s625_s7 = smov [#allocation8]  }
  0x19   :  { %s43_s6 = sshll.u32 %s624_s30, 4  ;;  %s55_s8 = sshll.u32 %s625_s7, 4  ;;  %s44_s6 = int_to_ptr.vmem [resolvable:$true] %s43_s6  ;;  %s56_s8 = int_to_ptr.vmem [resolvable:$true] %s55_s8 }
  0x1a   :  { %s560_s1 = scalar_lea.vmem %s44_s6, 1024  ;;  %p565_p11 = scmp.lt.s32.totalorder %s44_s6, %s44_s6 }
  0x1b   :  { %p561_p10 = scmp.ne.s32.totalorder %s44_s6, %s560_s1  ;;  %p566_p12 = scmp.lt.s32.totalorder %s560_s1, %s560_s1 }
  0x1d   :  { %p567_p13 = por %p566_p12, %p565_p11 }
  0x1f   :  { %p568_p0 = pnand %p567_p13, %p561_p10 }
  0x21   :  { %571 = shalt.err (!%p568_p0)
}
  0x22   :  { %49 = dma.hbm_to_vmem [thread:$0]  %s692_s2, 1024, %s44_s6, [#allocation6], %s622_s23, %s622_s23, %s623_s24  }
  0x23   :  { %s580_s0 = scalar_lea.vmem %s56_s8, 1024  ;;  %p585_p2 = scmp.lt.s32.totalorder %s56_s8, %s56_s8 }
  0x24   :  { %p581_p1 = scmp.ne.s32.totalorder %s56_s8, %s580_s0  ;;  %p586_p3 = scmp.lt.s32.totalorder %s580_s0, %s580_s0 }
  0x26   :  { %p587_p4 = por %p586_p3, %p585_p2 }
  0x28   :  { %p588_p5 = pnand %p587_p4, %p581_p1 }
  0x2a   :  { %591 = shalt.err (!%p588_p5)
}
  0x2b   :  { %61 = dma.hbm_to_vmem [thread:$0]  %s693_s3, 1024, %s56_s8, [#allocation9], %s622_s23, %s622_s23, %s623_s24  }
  0x2c   :  { %612 = dma.done.wait [#allocation3], 256  }
  0x2d   :  { %613 = vsyncadd [#allocation3], 4294967040 }
  0x2e   :  { %614 = dma.done.wait [#allocation6], 1280  }
  0x2f   :  { %615 = vsyncadd [#allocation6], 4294966016 }
  0x30   :  { %616 = dma.done.wait [#allocation9], 1024  }
  0x31   :  { %617 = vsyncadd [#allocation9], 4294966272  ;;  %v492_v0 = vld [vmem:[#allocation8 + $0x38] sm:$0xff]   ;;  %v494_v2 = vld [vmem:[#allocation8 + $0x30] sm:$0xff]   ;;  %s626_s13 = smov [#allocation10]  }
  0x32   :  { %v493_v1 = vld [vmem:[#allocation7 + $0x38] sm:$0xff]   ;;  %445 = vmatprep.subr.bf16.mxu0 %v492_v0  ;;  %v495_v3 = vld [vmem:[#allocation7 + $0x30] sm:$0xff]   ;;  %v496_v4 = vld [vmem:[#allocation8 + $0x28] sm:$0xff]   ;;  %s371_s14 = sshll.u32 %s626_s13, 4  ;;  %s372_s14 = int_to_ptr.vmem [resolvable:$true] %s371_s14 }
  0x33   :  { %465 = vmatprep.subr.bf16.mxu1 %v493_v1  ;;  %446 = vmatpush3.bf16.msra.mxu0 %v492_v0  ;;  %v497_v5 = vld [vmem:[#allocation7 + $0x28] sm:$0xff]   ;;  %v498_v6 = vld [vmem:[#allocation8 + $0x20] sm:$0xff]   ;;  %v500_v8 = vld [vmem:[#allocation8 + $0x18] sm:$0xff]   ;;  %s592_s15 = scalar_lea.vmem %s372_s14, 256  ;;  %p597_p7 = scmp.lt.s32.totalorder %s372_s14, %s372_s14 }
  0x34   :  { %466 = vmatpush3.bf16.msra.mxu1 %v493_v1  ;;  %447 = vmatprep.subr.bf16.mxu0 %v494_v2  ;;  %v499_v7 = vld [vmem:[#allocation7 + $0x20] sm:$0xff]   ;;  %v501_v9 = vld [vmem:[#allocation7 + $0x18] sm:$0xff]   ;;  %v502_v10 = vld [vmem:[#allocation8 + $0x10] sm:$0xff]   ;;  %p593_p6 = scmp.ne.s32.totalorder %s372_s14, %s592_s15  ;;  %p598_p8 = scmp.lt.s32.totalorder %s592_s15, %s592_s15 }
  0x35   :  { %467 = vmatprep.subr.bf16.mxu1 %v495_v3  ;;  %v503_v11 = vld [vmem:[#allocation7 + $0x10] sm:$0xff]   ;;  %v509_v13 = vld [vmem:[#allocation2] sm:$0xff]   ;;  %v504_v14 = vld [vmem:[#allocation8 + $0x8] sm:$0xff]  }
  0x36   :  { %v508_v12 = vld [vmem:[#allocation5] sm:$0xff]   ;;  %481 = vmatprep.mubr.bf16.mxu1 %v509_v13  ;;  %v505_v15 = vld [vmem:[#allocation7 + $0x8] sm:$0xff]   ;;  %v506_v16 = vld [vmem:[#allocation8] sm:$0xff]   ;;  %p599_p9 = por %p598_p8, %p597_p7 }
  0x37   :  { %448 = vmatpush3.bf16.msra.mxu0 %v494_v2  ;;  %461 = vmatprep.mubr.bf16.mxu0 %v508_v12  ;;  %v507_v17 = vld [vmem:[#allocation7] sm:$0xff]   ;;  %v510_v18 = vld [vmem:[#allocation5 + $0x8] sm:$0xff]   ;;  %v511_v19 = vld [vmem:[#allocation2 + $0x8] sm:$0xff]  }
  0x38   :  { %468 = vmatpush3.bf16.msra.mxu1 %v495_v3  ;;  %449 = vmatprep.subr.bf16.mxu0 %v496_v4  ;;  %v405_v26 = vld [vmem:[%s694_s4] ss:$0 sm:$0xff]  ;;  %p600_p10 = pnand %p599_p9, %p593_p6 }
  0x39   :  { %469 = vmatprep.subr.bf16.mxu1 %v497_v5 }
  0x3b   :  { %450 = vmatpush3.bf16.msra.mxu0 %v496_v4 }
  0x3c   :  { %470 = vmatpush3.bf16.msra.mxu1 %v497_v5  ;;  %451 = vmatprep.subr.bf16.mxu0 %v498_v6 }
  0x3d   :  { %471 = vmatprep.subr.bf16.mxu1 %v499_v7 }
  0x3f   :  { %452 = vmatpush3.bf16.msra.mxu0 %v498_v6 }
  0x40   :  { %472 = vmatpush3.bf16.msra.mxu1 %v499_v7  ;;  %453 = vmatprep.subr.bf16.mxu0 %v500_v8 }
  0x41   :  { %473 = vmatprep.subr.bf16.mxu1 %v501_v9 }
  0x43   :  { %454 = vmatpush3.bf16.msra.mxu0 %v500_v8 }
  0x44   :  { %474 = vmatpush3.bf16.msra.mxu1 %v501_v9  ;;  %455 = vmatprep.subr.bf16.mxu0 %v502_v10 }
  0x45   :  { %475 = vmatprep.subr.bf16.mxu1 %v503_v11 }
  0x47   :  { %456 = vmatpush3.bf16.msra.mxu0 %v502_v10 }
  0x48   :  { %476 = vmatpush3.bf16.msra.mxu1 %v503_v11  ;;  %457 = vmatprep.subr.bf16.mxu0 %v504_v14 }
  0x49   :  { %477 = vmatprep.subr.bf16.mxu1 %v505_v15 }
  0x4b   :  { %458 = vmatpush3.bf16.msra.mxu0 %v504_v14 }
  0x4c   :  { %478 = vmatpush3.bf16.msra.mxu1 %v505_v15  ;;  %459 = vmatprep.subr.bf16.mxu0 %v506_v16 }
  0x4d   :  { %479 = vmatprep.subr.bf16.mxu1 %v507_v17 }
  0x4f   :  { %460 = vmatpush3.bf16.msra.mxu0 %v506_v16 }
  0x50   :  { %480 = vmatpush3.bf16.msra.mxu1 %v507_v17 }
  0x52   :  { %462 = vmatmul.mubr.bf16.vlgmr.msra.gmra.mxu0 %v510_v18 }
  0x53   :  { %482 = vmatmul.mubr.bf16.vlgmr.msra.gmra.mxu1 %v511_v19 }
 0x112   :  { %v463_v20 = vpop.f32.mrf.mxu0 }
 0x113   :  { %v483_v21 = vpop.f32.mrf.mxu1 }
 0x114   :  { %v211_v22 = vpop.f32.mrf.mxu0  ;;  %v329_v24 = vadd.f32 %v483_v21, %v463_v20 }
 0x115   :  { %v320_v23 = vpop.f32.mrf.mxu1 }
 0x116   :  { %v464_v25 = vpop.f32.mrf.mxu0  ;;  %v321_v28 = vadd.f32 %v320_v23, %v211_v22  ;;  %v344_v32 = vadd.f32 %v405_v26, %v329_v24 }
 0x117   :  { %v484_v27 = vpop.f32.mrf.mxu1 }
 0x118   :  { %v332_v29 = vadd.f32 %v484_v27, %v464_v25  ;;  %v214_v30 = vpop.f32.mrf.mxu0  ;;  %v342_v35 = vadd.f32 %v405_v26, %v321_v28 }
 0x119   :  { %v323_v31 = vpop.f32.mrf.mxu1 }
 0x11a   :  { %v345_v33 = vadd.f32 %v405_v26, %v332_v29  ;;  %v324_v34 = vadd.f32 %v323_v31, %v214_v30 }
 0x11c   :  { %v422_v36 = vpack.c.bf16 %v345_v33, %v344_v32  ;;  %v343_v37 = vadd.f32 %v405_v26, %v324_v34 }
 0x11e   :  { %424 = vst [vmem:[#allocation10 + $0x8] sm:$0xff] %v422_v36   ;;  %v417_v38 = vpack.c.bf16 %v343_v37, %v342_v35 }
 0x120   :  { %418 = vst [vmem:[#allocation10] sm:$0xff] %v417_v38  }
 0x121   :  { %603 = shalt.err (!%p600_p10)
}
 0x122   :  { %377 = dma.vmem_to_hbm [thread:$0]  %s372_s14, 256, %s695_s5, [#allocation4], %s622_s23, %s622_s23, %s623_s24  }
 0x123   :  { %618 = dma.done.wait [#allocation4], 256  }
 0x124   :  { %619 = vsyncadd [#allocation4], 4294967040 }
 0x125   :  { %381 = vsyncpa [#allocation3], 1 }
 0x126   :  { %382 = vsyncpa [#allocation6], 1 }
 0x127   :  { %383 = vsyncpa [#allocation9], 1 }
 0x128   :  { %384 = vsyncpa [#allocation4], 1 }

// kernel: tpu_custom_call.1
= control target key start
LH: loop header
LB: loop body
LE: loop exit
PB: predicated region body
PF: predicated region fallthrough
CT: control target
= control target key end

     0   :  { %10 = vsyncpa [#allocation3], 0  ;;  %s690_s0 = inlined_call_operand.hbm [shape: bf16[32,128], index: 0, kind: input, shape index: {}]   ;;  %s691_s1 = inlined_call_operand.hbm [shape: bf16[32,128], index: 1, kind: input, shape index: {}]   ;;  %s692_s2 = inlined_call_operand.hbm [shape: bf16[128,128], index: 2, kind: input, shape index: {}]   ;;  %s693_s3 = inlined_call_operand.hbm [shape: bf16[128,128], index: 3, kind: input, shape index: {}]   ;;  %s694_s4 = inlined_call_operand.vmem [shape: f32[1,128], index: 4, kind: input, shape index: {}]   ;;  %s695_s5 = inlined_call_operand.hbm [shape: bf16[32,128], index: 5, kind: output, shape index: {}]  }
   0x1   :  { %11 = vsyncpa [#allocation6], 0 }
   0x2   :  { %12 = vsyncpa [#allocation9], 0 }
   0x3   :  { %13 = vsyncpa [#allocation4], 0  ;;  %s620_s18 = smov [#allocation5]   ;;  %s621_s20 = smov [#allocation2]  }
   0x4   :  { %s31_s19 = sshll.u32 %s620_s18, 4  ;;  %s19_s21 = sshll.u32 %s621_s20, 4  ;;  %s32_s19 = int_to_ptr.vmem [resolvable:$true] %s31_s19  ;;  %s20_s21 = int_to_ptr.vmem [resolvable:$true] %s19_s21 }
   0x5   :  { %s520_s22 = scalar_lea.vmem %s32_s19, 256  ;;  %p525_p1 = scmp.lt.s32.totalorder %s32_s19, %s32_s19 }
   0x6   :  { %p521_p0 = scmp.ne.s32.totalorder %s32_s19, %s520_s22  ;;  %p526_p2 = scmp.lt.s32.totalorder %s520_s22, %s520_s22 }
   0x8   :  { %p527_p3 = por %p526_p2, %p525_p1 }
   0xa   :  { %p528_p4 = pnand %p527_p3, %p521_p0 }
   0xc   :  { %531 = shalt.err (!%p528_p4)
}
   0xd   :  { %s622_s23 = smov 64   ;;  %s623_s24 = smov 4  }
   0xe   :  { %37 = dma.hbm_to_vmem [thread:$0]  %s691_s1, 256, %s32_s19, [#allocation6], %s622_s23, %s622_s23, %s623_s24  }
   0xf   :  { %s540_s27 = scalar_lea.vmem %s20_s21, 256  ;;  %p545_p6 = scmp.lt.s32.totalorder %s20_s21, %s20_s21 }
  0x10   :  { %p541_p5 = scmp.ne.s32.totalorder %s20_s21, %s540_s27  ;;  %p546_p7 = scmp.lt.s32.totalorder %s540_s27, %s540_s27 }
  0x12   :  { %p547_p8 = por %p546_p7, %p545_p6 }
  0x14   :  { %p548_p9 = pnand %p547_p8, %p541_p5 }
  0x16   :  { %551 = shalt.err (!%p548_p9)
}
  0x17   :  { %25 = dma.hbm_to_vmem [thread:$0]  %s690_s0, 256, %s20_s21, [#allocation3], %s622_s23, %s622_s23, %s623_s24  }
  0x18   :  { %s624_s30 = smov [#allocation7]   ;;  %s625_s7 = smov [#allocation8]  }
  0x19   :  { %s43_s6 = sshll.u32 %s624_s30, 4  ;;  %s55_s8 = sshll.u32 %s625_s7, 4  ;;  %s44_s6 = int_to_ptr.vmem [resolvable:$true] %s43_s6  ;;  %s56_s8 = int_to_ptr.vmem [resolvable:$true] %s55_s8 }
  0x1a   :  { %s560_s1 = scalar_lea.vmem %s44_s6, 1024  ;;  %p565_p11 = scmp.lt.s32.totalorder %s44_s6, %s44_s6 }
  0x1b   :  { %p561_p10 = scmp.ne.s32.totalorder %s44_s6, %s560_s1  ;;  %p566_p12 = scmp.lt.s32.totalorder %s560_s1, %s560_s1 }
  0x1d   :  { %p567_p13 = por %p566_p12, %p565_p11 }
  0x1f   :  { %p568_p0 = pnand %p567_p13, %p561_p10 }
  0x21   :  { %571 = shalt.err (!%p568_p0)
}
  0x22   :  { %49 = dma.hbm_to_vmem [thread:$0]  %s692_s2, 1024, %s44_s6, [#allocation6], %s622_s23, %s622_s23, %s623_s24  }
  0x23   :  { %s580_s0 = scalar_lea.vmem %s56_s8, 1024  ;;  %p585_p2 = scmp.lt.s32.totalorder %s56_s8, %s56_s8 }
  0x24   :  { %p581_p1 = scmp.ne.s32.totalorder %s56_s8, %s580_s0  ;;  %p586_p3 = scmp.lt.s32.totalorder %s580_s0, %s580_s0 }
  0x26   :  { %p587_p4 = por %p586_p3, %p585_p2 }
  0x28   :  { %p588_p5 = pnand %p587_p4, %p581_p1 }
  0x2a   :  { %591 = shalt.err (!%p588_p5)
}
  0x2b   :  { %61 = dma.hbm_to_vmem [thread:$0]  %s693_s3, 1024, %s56_s8, [#allocation9], %s622_s23, %s622_s23, %s623_s24  }
  0x2c   :  { %612 = dma.done.wait [#allocation3], 256  }
  0x2d   :  { %613 = vsyncadd [#allocation3], 4294967040 }
  0x2e   :  { %614 = dma.done.wait [#allocation6], 1280  }
  0x2f   :  { %615 = vsyncadd [#allocation6], 4294966016 }
  0x30   :  { %616 = dma.done.wait [#allocation9], 1024  }
  0x31   :  { %617 = vsyncadd [#allocation9], 4294966272  ;;  %v492_v0 = vld [vmem:[#allocation8 + $0x38] sm:$0xff]   ;;  %v494_v2 = vld [vmem:[#allocation8 + $0x30] sm:$0xff]   ;;  %s626_s13 = smov [#allocation10]  }
  0x32   :  { %v493_v1 = vld [vmem:[#allocation7 + $0x38] sm:$0xff]   ;;  %445 = vmatprep.subr.bf16.mxu0 %v492_v0  ;;  %v495_v3 = vld [vmem:[#allocation7 + $0x30] sm:$0xff]   ;;  %v496_v4 = vld [vmem:[#allocation8 + $0x28] sm:$0xff]   ;;  %s371_s14 = sshll.u32 %s626_s13, 4  ;;  %s372_s14 = int_to_ptr.vmem [resolvable:$true] %s371_s14 }
  0x33   :  { %465 = vmatprep.subr.bf16.mxu1 %v493_v1  ;;  %446 = vmatpush3.bf16.msra.mxu0 %v492_v0  ;;  %v497_v5 = vld [vmem:[#allocation7 + $0x28] sm:$0xff]   ;;  %v498_v6 = vld [vmem:[#allocation8 + $0x20] sm:$0xff]   ;;  %v500_v8 = vld [vmem:[#allocation8 + $0x18] sm:$0xff]   ;;  %s592_s15 = scalar_lea.vmem %s372_s14, 256  ;;  %p597_p7 = scmp.lt.s32.totalorder %s372_s14, %s372_s14 }
  0x34   :  { %466 = vmatpush3.bf16.msra.mxu1 %v493_v1  ;;  %447 = vmatprep.subr.bf16.mxu0 %v494_v2  ;;  %v499_v7 = vld [vmem:[#allocation7 + $0x20] sm:$0xff]   ;;  %v501_v9 = vld [vmem:[#allocation7 + $0x18] sm:$0xff]   ;;  %v502_v10 = vld [vmem:[#allocation8 + $0x10] sm:$0xff]   ;;  %p593_p6 = scmp.ne.s32.totalorder %s372_s14, %s592_s15  ;;  %p598_p8 = scmp.lt.s32.totalorder %s592_s15, %s592_s15 }
  0x35   :  { %467 = vmatprep.subr.bf16.mxu1 %v495_v3  ;;  %v503_v11 = vld [vmem:[#allocation7 + $0x10] sm:$0xff]   ;;  %v509_v13 = vld [vmem:[#allocation2] sm:$0xff]   ;;  %v504_v14 = vld [vmem:[#allocation8 + $0x8] sm:$0xff]  }
  0x36   :  { %v508_v12 = vld [vmem:[#allocation5] sm:$0xff]   ;;  %481 = vmatprep.mubr.bf16.mxu1 %v509_v13  ;;  %v505_v15 = vld [vmem:[#allocation7 + $0x8] sm:$0xff]   ;;  %v506_v16 = vld [vmem:[#allocation8] sm:$0xff]   ;;  %p599_p9 = por %p598_p8, %p597_p7 }
  0x37   :  { %448 = vmatpush3.bf16.msra.mxu0 %v494_v2  ;;  %461 = vmatprep.mubr.bf16.mxu0 %v508_v12  ;;  %v507_v17 = vld [vmem:[#allocation7] sm:$0xff]   ;;  %v510_v18 = vld [vmem:[#allocation5 + $0x8] sm:$0xff]   ;;  %v511_v19 = vld [vmem:[#allocation2 + $0x8] sm:$0xff]  }
  0x38   :  { %468 = vmatpush3.bf16.msra.mxu1 %v495_v3  ;;  %449 = vmatprep.subr.bf16.mxu0 %v496_v4  ;;  %v405_v26 = vld [vmem:[%s694_s4] ss:$0 sm:$0xff]  ;;  %p600_p10 = pnand %p599_p9, %p593_p6 }
  0x39   :  { %469 = vmatprep.subr.bf16.mxu1 %v497_v5 }
  0x3b   :  { %450 = vmatpush3.bf16.msra.mxu0 %v496_v4 }
  0x3c   :  { %470 = vmatpush3.bf16.msra.mxu1 %v497_v5  ;;  %451 = vmatprep.subr.bf16.mxu0 %v498_v6 }
  0x3d   :  { %471 = vmatprep.subr.bf16.mxu1 %v499_v7 }
  0x3f   :  { %452 = vmatpush3.bf16.msra.mxu0 %v498_v6 }
  0x40   :  { %472 = vmatpush3.bf16.msra.mxu1 %v499_v7  ;;  %453 = vmatprep.subr.bf16.mxu0 %v500_v8 }
  0x41   :  { %473 = vmatprep.subr.bf16.mxu1 %v501_v9 }
  0x43   :  { %454 = vmatpush3.bf16.msra.mxu0 %v500_v8 }
  0x44   :  { %474 = vmatpush3.bf16.msra.mxu1 %v501_v9  ;;  %455 = vmatprep.subr.bf16.mxu0 %v502_v10 }
  0x45   :  { %475 = vmatprep.subr.bf16.mxu1 %v503_v11 }
  0x47   :  { %456 = vmatpush3.bf16.msra.mxu0 %v502_v10 }
  0x48   :  { %476 = vmatpush3.bf16.msra.mxu1 %v503_v11  ;;  %457 = vmatprep.subr.bf16.mxu0 %v504_v14 }
  0x49   :  { %477 = vmatprep.subr.bf16.mxu1 %v505_v15 }
  0x4b   :  { %458 = vmatpush3.bf16.msra.mxu0 %v504_v14 }
  0x4c   :  { %478 = vmatpush3.bf16.msra.mxu1 %v505_v15  ;;  %459 = vmatprep.subr.bf16.mxu0 %v506_v16 }
  0x4d   :  { %479 = vmatprep.subr.bf16.mxu1 %v507_v17 }
  0x4f   :  { %460 = vmatpush3.bf16.msra.mxu0 %v506_v16 }
  0x50   :  { %480 = vmatpush3.bf16.msra.mxu1 %v507_v17 }
  0x52   :  { %462 = vmatmul.mubr.bf16.vlgmr.msra.gmra.mxu0 %v510_v18 }
  0x53   :  { %482 = vmatmul.mubr.bf16.vlgmr.msra.gmra.mxu1 %v511_v19 }
 0x112   :  { %v463_v20 = vpop.f32.mrf.mxu0 }
 0x113   :  { %v483_v21 = vpop.f32.mrf.mxu1 }
 0x114   :  { %v211_v22 = vpop.f32.mrf.mxu0  ;;  %v329_v24 = vadd.f32 %v483_v21, %v463_v20 }
 0x115   :  { %v320_v23 = vpop.f32.mrf.mxu1 }
 0x116   :  { %v464_v25 = vpop.f32.mrf.mxu0  ;;  %v321_v28 = vadd.f32 %v320_v23, %v211_v22  ;;  %v344_v32 = vadd.f32 %v405_v26, %v329_v24 }
 0x117   :  { %v484_v27 = vpop.f32.mrf.mxu1 }
 0x118   :  { %v332_v29 = vadd.f32 %v484_v27, %v464_v25  ;;  %v214_v30 = vpop.f32.mrf.mxu0  ;;  %v342_v35 = vadd.f32 %v405_v26, %v321_v28 }
 0x119   :  { %v323_v31 = vpop.f32.mrf.mxu1 }
 0x11a   :  { %v345_v33 = vadd.f32 %v405_v26, %v332_v29  ;;  %v324_v34 = vadd.f32 %v323_v31, %v214_v30 }
 0x11c   :  { %v422_v36 = vpack.c.bf16 %v345_v33, %v344_v32  ;;  %v343_v37 = vadd.f32 %v405_v26, %v324_v34 }
 0x11e   :  { %424 = vst [vmem:[#allocation10 + $0x8] sm:$0xff] %v422_v36   ;;  %v417_v38 = vpack.c.bf16 %v343_v37, %v342_v35 }
 0x120   :  { %418 = vst [vmem:[#allocation10] sm:$0xff] %v417_v38  }
 0x121   :  { %603 = shalt.err (!%p600_p10)
}
 0x122   :  { %377 = dma.vmem_to_hbm [thread:$0]  %s372_s14, 256, %s695_s5, [#allocation4], %s622_s23, %s622_s23, %s623_s24  }
 0x123   :  { %618 = dma.done.wait [#allocation4], 256  }
 0x124   :  { %619 = vsyncadd [#allocation4], 4294967040 }
 0x125   :  { %381 = vsyncpa [#allocation3], 1 }
 0x126   :  { %382 = vsyncpa [#allocation6], 1 }
 0x127   :  { %383 = vsyncpa [#allocation9], 1 }
 0x128   :  { %384 = vsyncpa [#allocation4], 1 }

</bundles_post_ra>
